<compile_context>
chip_gen: v6e
topology: v6e:2x2x1
jax: 0.10.0
libtpu: 0.0.40
codegen_flags: <defaults>
</compile_context>

<pallas_src>
import functools

import jax
import jax.numpy as jnp
from jax import lax
from jax.experimental import pallas as pl
from jax.experimental.pallas import tpu as pltpu


_LANE = 128            # slab pad granularity (256 preferred on v6e/v7x if waste is OK)
_FIRST_DOT_LANES = 512  # lane width per batched first-contraction chunk in biaffine


def _round_up(n, m):
    return ((n + m - 1) // m) * m


def _pad_axis(x, axis, target):
    if x.shape[axis] == target:
        return x
    widths = [(0, 0)] * x.ndim
    widths[axis] = (0, target - x.shape[axis])
    return jnp.pad(x, widths)


# ---------------------------------------------------------------------------
# Kernel 1: fused (Linear + ReLU) for BOTH MLPs as one wide matmul.
#   x:     (TN, D) f32 row tile of the flattened (B*L, D) activations
#   w_all: (D, O) bf16   -- [arc_head | arc_dep | lbl_head | lbl_dep] slabs,
#                           each zero-padded to a multiple of 128 lanes
#   b_all: (1, O) f32
#   o_*:   (TN, O_k)     -- relu(x @ w + b) slab, cast to compute dtype
# ---------------------------------------------------------------------------
def _fused_mlp_relu_kernel(x_ref, w_ref, b_ref, ah_ref, ad_ref, lh_ref, ld_ref):
    # Cast to the compute dtype in-kernel (saves a full HBM round-trip of x).
    x = x_ref[...].astype(w_ref.dtype)
    y = jnp.dot(x, w_ref[...], preferred_element_type=jnp.float32)
    y = jnp.maximum(y + b_ref[...], 0.0)
    # Slab offsets are multiples of 128 -> tile-aligned slices, unmasked stores.
    off = 0
    for o_ref in (ah_ref, ad_ref, lh_ref, ld_ref):
        w = o_ref.shape[-1]
        o_ref[...] = y[:, off:off + w].astype(o_ref.dtype)
        off += w


def fused_mlp_relu(x2d, w_all, b_all, out_widths, out_dtype, *, row_tile=512):
    """One pallas_call computing relu(x @ W + b) for all 4 head/dep slabs."""
    N, D = x2d.shape
    O = w_all.shape[1]
    tn = min(row_tile, N)          # trailing partial blocks are clipped on store
    grid = (pl.cdiv(N, tn),)

    in_specs = [
        pl.BlockSpec((tn, D), lambda i: (i, 0)),
        pl.BlockSpec((D, O), lambda i: (0, 0)),
        pl.BlockSpec((1, O), lambda i: (0, 0)),
    ]
    out_shape = tuple(jax.ShapeDtypeStruct((N, w), out_dtype) for w in out_widths)
    out_specs = tuple(pl.BlockSpec((tn, w), lambda i: (i, 0)) for w in out_widths)

    return pl.pallas_call(
        _fused_mlp_relu_kernel,
        out_shape=out_shape,
        grid=grid,
        in_specs=in_specs,
        out_specs=out_specs,
        compiler_params=pltpu.CompilerParams(dimension_semantics=("parallel",)),
    )(x2d, w_all, b_all)


# ---------------------------------------------------------------------------
# Kernel 2: biaffine scorer, bias "ones" columns folded in algebraically.
#
#   score[r, j, i] = head[j,:] @ (dep[i,:] @ W_core[r])^T          (core, bf16 MXU)
#                  + head[j,:] @ brow[r,:]                          (dep-bias row, f32)
#                  + wcol[r,:] . dep[i,:] + corner[r]               (head-bias col, label only)
#
#   grid = (B, dep tiles, head tiles); head axis innermost ("arbitrary") so the
#   per-dep-tile scratch a[r] = dep @ W_core[r] is reused across head tiles.
# ---------------------------------------------------------------------------
_NT = (((1,), (1,)), ((), ()))   # contract axis 1 of both operands (A @ B^T)


def _biaffine_kernel(dep_ref, head_ref, wbig_ref, brow_ref, wcol_ref, corner_ref,
                     o_ref, a_scr, c_scr, *, r_size, dh_pad, has_head_bias):
    jh = pl.program_id(2)

    @pl.when(jh == 0)
    def _():
        dep = dep_ref[0]                                    # (tLd, Ddp) bf16
        # First contraction batched over r in wide lane chunks (fills the MXU
        # without materialising one huge f32 temp), stored per-r in scratch.
        group = max(1, _FIRST_DOT_LANES // dh_pad)
        for r0 in range(0, r_size, group):
            g = min(group, r_size - r0)
            sl = slice(r0 * dh_pad, (r0 + g) * dh_pad)
            a = jnp.dot(dep, wbig_ref[:, sl], preferred_element_type=jnp.float32)
            for t in range(g):
                a_scr[r0 + t] = a[:, t * dh_pad:(t + 1) * dh_pad].astype(a_scr.dtype)
        if has_head_bias:
            # c[r, i] = wcol[r] . dep[i] + corner[r]
            c = lax.dot_general(wcol_ref[...], dep, _NT,
                                preferred_element_type=jnp.float32)   # (R, tLd)
            c_scr[...] = c + corner_ref[...]

    head = head_ref[0]                                      # (tLh, Dhp) bf16
    head_f32 = head.astype(jnp.float32)                     # for the f32 brow term

    def body(r, carry):
        # Core term: MXU NT form, f32 accumulation.
        s = lax.dot_general(head, a_scr[r], _NT,
                            preferred_element_type=jnp.float32)       # (tLh, tLd)
        # Dep-bias row term kept in f32 and added after the second dot.
        hb = lax.dot_general(head_f32, brow_ref[pl.ds(r, 1), :], _NT,
                             preferred_element_type=jnp.float32)      # (tLh, 1)
        s = s + hb
        if has_head_bias:
            s = s + c_scr[pl.ds(r, 1), :]                             # (1, tLd)
        o_ref[r] = s.astype(o_ref.dtype)
        return carry

    lax.fori_loop(0, r_size, body, 0)


def biaffine(dep, head, w_big, brow, wcol, corner, *, r_size, dh_pad,
             has_head_bias, out_dtype, dep_tile=256, head_tile=128):
    B, L, ddp = dep.shape
    dhp = head.shape[2]
    tld = min(dep_tile, L)
    tlh = min(head_tile, L)
    grid = (B, pl.cdiv(L, tld), pl.cdiv(L, tlh))

    kernel = functools.partial(_biaffine_kernel, r_size=r_size, dh_pad=dh_pad,
                               has_head_bias=has_head_bias)
    out = pl.pallas_call(
        kernel,
        out_shape=jax.ShapeDtypeStruct((B * r_size, L, L), out_dtype),
        grid=grid,
        in_specs=[
            pl.BlockSpec((1, tld, ddp), lambda b, i, j: (b, i, 0)),        # dep tile
            pl.BlockSpec((1, tlh, dhp), lambda b, i, j: (b, j, 0)),        # head tile
            pl.BlockSpec((ddp, r_size * dh_pad), lambda b, i, j: (0, 0)),  # W_core (per-r slabs)
            pl.BlockSpec((r_size, dh_pad), lambda b, i, j: (0, 0)),        # brow (f32)
            pl.BlockSpec(wcol.shape, lambda b, i, j: (0, 0)),              # wcol
            pl.BlockSpec(corner.shape, lambda b, i, j: (0, 0)),            # corner (f32)
        ],
        out_specs=pl.BlockSpec((r_size, tlh, tld), lambda b, i, j: (b, j, i)),
        scratch_shapes=[
            pltpu.VMEM((r_size, tld, dh_pad), dep.dtype),   # a[r] = dep @ W_core[r]
            pltpu.VMEM((r_size, tld), jnp.float32),          # c[r, i]
        ],
        compiler_params=pltpu.CompilerParams(
            dimension_semantics=("parallel", "parallel", "arbitrary")),
    )(dep, head, w_big, brow, wcol, corner)
    return out.reshape(B, r_size, L, L)   # (B, R, L_head, L_dep)


# ---------------------------------------------------------------------------
# BaseModel (eval-mode forward) with deterministically initialized parameters.
# ---------------------------------------------------------------------------
class BaseModelPallas:
    def __init__(self, key, d_model, arc_size, label_size, rel_size,
                 compute_dtype=jnp.bfloat16):
        ks = jax.random.split(key, 6)
        u = lambda k, shape: jax.random.uniform(
            k, shape, minval=-0.1, maxval=0.1, dtype=jnp.float32)
        cd = compute_dtype
        self.compute_dtype = cd
        self.arc_size, self.label_size, self.rel_size = arc_size, label_size, rel_size
        A, Lb, R = arc_size, label_size, rel_size

        # Full f32 parameters (also used by the pure-JAX reference check).
        self.w_arc_ref = u(ks[0], (d_model, 2 * A))
        self.b_arc_ref = u(ks[1], (1, 2 * A))
        self.w_lbl_ref = u(ks[2], (d_model, 2 * Lb))
        self.b_lbl_ref = u(ks[3], (1, 2 * Lb))
        self.u_arc_ref = u(ks[4], (1, A + 1, A))                 # bias=(True, False)
        self.u_lbl_ref = u(ks[5], (R, Lb + 1, Lb + 1))           # bias=(True, True)

        # ---- MLP: one concatenated, lane-padded weight (chunk order [head|dep]).
        Ap = _round_up(A, _LANE)
        Lp = _round_up(Lb, _LANE)
        self.arc_pad, self.lbl_pad = Ap, Lp
        w_slabs = [_pad_axis(self.w_arc_ref[:, :A], 1, Ap),
                   _pad_axis(self.w_arc_ref[:, A:], 1, Ap),
                   _pad_axis(self.w_lbl_ref[:, :Lb], 1, Lp),
                   _pad_axis(self.w_lbl_ref[:, Lb:], 1, Lp)]
        b_slabs = [_pad_axis(self.b_arc_ref[:, :A], 1, Ap),
                   _pad_axis(self.b_arc_ref[:, A:], 1, Ap),
                   _pad_axis(self.b_lbl_ref[:, :Lb], 1, Lp),
                   _pad_axis(self.b_lbl_ref[:, Lb:], 1, Lp)]
        self.w_all = jnp.concatenate(w_slabs, axis=1).astype(cd)   # (D, 2Ap+2Lp)
        self.b_all = jnp.concatenate(b_slabs, axis=1)              # (1, 2Ap+2Lp) f32
        self.mlp_out_widths = (Ap, Ap, Lp, Lp)

        # ---- Arc biaffine (bias=(True, False)): core + dep-bias row only.
        core_a = _pad_axis(_pad_axis(self.u_arc_ref[:, :A, :], 1, Ap), 2, Ap)   # (1, Ap, Ap)
        self.uarc_wbig = jnp.transpose(core_a, (1, 0, 2)).reshape(Ap, Ap).astype(cd)
        self.uarc_brow = _pad_axis(self.u_arc_ref[:, A:, :], 2, Ap).reshape(1, Ap)   # f32
        self.uarc_wcol = jnp.zeros((1, Ap), cd)                    # unused (no head bias)
        self.uarc_corner = jnp.zeros((1, 1), jnp.float32)          # unused

        # ---- Label biaffine (bias=(True, True)).
        core_l = _pad_axis(_pad_axis(self.u_lbl_ref[:, :Lb, :Lb], 1, Lp), 2, Lp)  # (R, Lp, Lp)
        self.ulbl_wbig = jnp.transpose(core_l, (1, 0, 2)).reshape(Lp, R * Lp).astype(cd)
        self.ulbl_brow = _pad_axis(self.u_lbl_ref[:, Lb:, :Lb], 2, Lp).reshape(R, Lp)  # f32
        self.ulbl_wcol = _pad_axis(self.u_lbl_ref[:, :Lb, Lb:].reshape(R, Lb),
                                   1, Lp).astype(cd)               # (R, Lp)
        self.ulbl_corner = self.u_lbl_ref[:, Lb:, Lb:].reshape(R, 1)   # (R, 1) f32

    def __call__(self, bert_out):
        B, L, D = bert_out.shape
        x2d = bert_out.reshape(B * L, D)   # stays f32; cast happens inside the kernel

        ah, ad, lh, ld = fused_mlp_relu(
            x2d, self.w_all, self.b_all, self.mlp_out_widths,
            out_dtype=self.compute_dtype)
        arc_head = ah.reshape(B, L, self.arc_pad)
        arc_dep = ad.reshape(B, L, self.arc_pad)
        lbl_head = lh.reshape(B, L, self.lbl_pad)
        lbl_dep = ld.reshape(B, L, self.lbl_pad)

        # Arc scores (R == 1): f32 out of the kernel, free reshape (no transpose).
        arc_raw = biaffine(arc_dep, arc_head, self.uarc_wbig, self.uarc_brow,
                           self.uarc_wcol, self.uarc_corner,
                           r_size=1, dh_pad=self.arc_pad,
                           has_head_bias=False, out_dtype=jnp.float32)   # (B,1,L,L)
        arc_score = arc_raw.reshape(B, L, L, 1)

        # Label scores: bf16 kernel stores (write-bound branch); one fused XLA
        # transpose+upcast produces the torch layout (B, L_head, L_dep, R) in f32.
        lbl_raw = biaffine(lbl_dep, lbl_head, self.ulbl_wbig, self.ulbl_brow,
                           self.ulbl_wcol, self.ulbl_corner,
                           r_size=self.rel_size, dh_pad=self.lbl_pad,
                           has_head_bias=True, out_dtype=self.compute_dtype)  # (B,R,L,L)
        lbl_score = jnp.transpose(lbl_raw, (0, 2, 3, 1)).astype(jnp.float32)
        return arc_score, lbl_score


# ---------------------------------------------------------------------------
# Pure-JAX f32 reference for a correctness sanity check.
# ---------------------------------------------------------------------------
def _reference(model, bert_out):
    arc_feat = jax.nn.relu(bert_out @ model.w_arc_ref + model.b_arc_ref[0])
    lbl_feat = jax.nn.relu(bert_out @ model.w_lbl_ref + model.b_lbl_ref[0])
    arc_head, arc_dep = jnp.split(arc_feat, 2, axis=-1)
    lbl_head, lbl_dep = jnp.split(lbl_feat, 2, axis=-1)
    B, L, _ = bert_out.shape
    ones = jnp.ones((B, L, 1), jnp.float32)
    arc_dep_aug = jnp.concatenate([arc_dep, ones], axis=-1)
    lbl_dep_aug = jnp.concatenate([lbl_dep, ones], axis=-1)
    lbl_head_aug = jnp.concatenate([lbl_head, ones], axis=-1)
    arc_ref = jnp.einsum('bid,rde,bje->bjir', arc_dep_aug, model.u_arc_ref, arc_head)
    lbl_ref = jnp.einsum('bid,rde,bje->bjir', lbl_dep_aug, model.u_lbl_ref, lbl_head_aug)
    return arc_ref, lbl_ref


if __name__ == "__main__":
    B, L, D = 2, 8, 32          # batch, seq, d_model
    ARC, LBL, REL = 16, 8, 4    # arc_size, label_size, rel_size

    key = jax.random.PRNGKey(0)
    k_in, k_params = jax.random.split(key)
    bert_out = jax.random.normal(k_in, (B, L, D), dtype=jnp.float32)

    model = BaseModelPallas(k_params, D, ARC, LBL, REL)
    fwd = jax.jit(model.__call__)

    arc_score, lbl_score = fwd(bert_out)
    arc_score = jax.block_until_ready(arc_score)
    lbl_score = jax.block_until_ready(lbl_score)

    assert arc_score.shape == (B, L, L, 1)
    assert lbl_score.shape == (B, L, L, REL)
    assert arc_score.dtype == jnp.float32 and lbl_score.dtype == jnp.float32

    # bf16 MXU operands / bf16 label stores with f32 accumulation -> loosened tol.
    arc_ref, lbl_ref = _reference(model, bert_out)
    assert jnp.allclose(arc_score, arc_ref, atol=2e-2, rtol=2e-2)
    assert jnp.allclose(lbl_score, lbl_ref, atol=2e-2, rtol=2e-2)

    print("KERNEL_OK")
</pallas_src>

<mosaic_0001>
module attributes {stable_mosaic.version = 11 : i64} {
  func.func @_fused_mlp_relu_kernel(%arg0: i32, %arg1: memref<16x32xf32, #tpu.memory_space<vmem>>, %arg2: memref<32x512xbf16, #tpu.memory_space<vmem>>, %arg3: memref<1x512xf32, #tpu.memory_space<vmem>>, %arg4: memref<16x128xbf16, #tpu.memory_space<vmem>>, %arg5: memref<16x128xbf16, #tpu.memory_space<vmem>>, %arg6: memref<16x128xbf16, #tpu.memory_space<vmem>>, %arg7: memref<16x128xbf16, #tpu.memory_space<vmem>>) attributes {dimension_semantics = [#tpu.dimension_semantics<parallel>], iteration_bounds = array<i64: 1>, scalar_prefetch = 0 : i64, scratch_operands = 0 : i64, tpu.core_type = #tpu.core_type<tc>, window_params = [{transform_indices = @transform_0, window_bounds = array<i64: 16, 32>}, {pipeline_mode = #tpu.pipeline_mode<synchronous>, transform_indices = @transform_1, window_bounds = array<i64: 32, 512>}, {pipeline_mode = #tpu.pipeline_mode<synchronous>, transform_indices = @transform_2, window_bounds = array<i64: 1, 512>}, {transform_indices = @transform_3, window_bounds = array<i64: 16, 128>}, {transform_indices = @transform_4, window_bounds = array<i64: 16, 128>}, {transform_indices = @transform_5, window_bounds = array<i64: 16, 128>}, {transform_indices = @transform_6, window_bounds = array<i64: 16, 128>}]} {
    %c0 = arith.constant 0 : index
    %c0_0 = arith.constant 0 : index
    %0 = vector.load %arg1[%c0, %c0_0] : memref<16x32xf32, #tpu.memory_space<vmem>>, vector<16x32xf32>
    %1 = arith.truncf %0 : vector<16x32xf32> to vector<16x32xbf16>
    %c0_1 = arith.constant 0 : index
    %c0_2 = arith.constant 0 : index
    %2 = vector.load %arg2[%c0_1, %c0_2] : memref<32x512xbf16, #tpu.memory_space<vmem>>, vector<32x512xbf16>
    %cst = arith.constant dense<0.000000e+00> : vector<16x512xf32>
    %3 = tpu.matmul %1, %2, %cst {dimension_numbers = #tpu.dot_dimension_numbers<[1], [0], [0], [1], [0, 0, 1, 1], [], []>} : vector<16x32xbf16>, vector<32x512xbf16>, vector<16x512xf32> -> vector<16x512xf32>
    %c0_3 = arith.constant 0 : index
    %c0_4 = arith.constant 0 : index
    %4 = vector.load %arg3[%c0_3, %c0_4] : memref<1x512xf32, #tpu.memory_space<vmem>>, vector<1x512xf32>
    %5 = vector.broadcast %4 : vector<1x512xf32> to vector<16x512xf32>
    %6 = arith.addf %3, %5 : vector<16x512xf32>
    %cst_5 = arith.constant 0.000000e+00 : f32
    %7 = vector.broadcast %cst_5 : f32 to vector<16x512xf32>
    %8 = arith.maximumf %6, %7 : vector<16x512xf32>
    %9 = vector.extract_strided_slice %8 {offsets = [0, 0], sizes = [16, 128], strides = [1, 1]} : vector<16x512xf32> to vector<16x128xf32>
    %10 = arith.truncf %9 : vector<16x128xf32> to vector<16x128xbf16>
    %c0_6 = arith.constant 0 : index
    %c0_7 = arith.constant 0 : index
    %11 = vector.load %arg4[%c0_6, %c0_7] : memref<16x128xbf16, #tpu.memory_space<vmem>>, vector<16x128xbf16>
    tpu.vector_store %arg4[%c0_6, %c0_7], %10 {strides = array<i32>} : memref<16x128xbf16, #tpu.memory_space<vmem>>, vector<16x128xbf16>,
    %12 = vector.extract_strided_slice %8 {offsets = [0, 128], sizes = [16, 128], strides = [1, 1]} : vector<16x512xf32> to vector<16x128xf32>
    %13 = arith.truncf %12 : vector<16x128xf32> to vector<16x128xbf16>
    %c0_8 = arith.constant 0 : index
    %c0_9 = arith.constant 0 : index
    %14 = vector.load %arg5[%c0_8, %c0_9] : memref<16x128xbf16, #tpu.memory_space<vmem>>, vector<16x128xbf16>
    tpu.vector_store %arg5[%c0_8, %c0_9], %13 {strides = array<i32>} : memref<16x128xbf16, #tpu.memory_space<vmem>>, vector<16x128xbf16>,
    %15 = vector.extract_strided_slice %8 {offsets = [0, 256], sizes = [16, 128], strides = [1, 1]} : vector<16x512xf32> to vector<16x128xf32>
    %16 = arith.truncf %15 : vector<16x128xf32> to vector<16x128xbf16>
    %c0_10 = arith.constant 0 : index
    %c0_11 = arith.constant 0 : index
    %17 = vector.load %arg6[%c0_10, %c0_11] : memref<16x128xbf16, #tpu.memory_space<vmem>>, vector<16x128xbf16>
    tpu.vector_store %arg6[%c0_10, %c0_11], %16 {strides = array<i32>} : memref<16x128xbf16, #tpu.memory_space<vmem>>, vector<16x128xbf16>,
    %18 = vector.extract_strided_slice %8 {offsets = [0, 384], sizes = [16, 128], strides = [1, 1]} : vector<16x512xf32> to vector<16x128xf32>
    %19 = arith.truncf %18 : vector<16x128xf32> to vector<16x128xbf16>
    %c0_12 = arith.constant 0 : index
    %c0_13 = arith.constant 0 : index
    %20 = vector.load %arg7[%c0_12, %c0_13] : memref<16x128xbf16, #tpu.memory_space<vmem>>, vector<16x128xbf16>
    tpu.vector_store %arg7[%c0_12, %c0_13], %19 {strides = array<i32>} : memref<16x128xbf16, #tpu.memory_space<vmem>>, vector<16x128xbf16>,
    return
  }
  func.func @transform_0(%arg0: i32) -> (i32, i32) {
    %c0_i32 = arith.constant 0 : i32
    %c0_i32_0 = arith.constant 0 : i32
    return %arg0, %c0_i32 : i32, i32
  }
  func.func @transform_1(%arg0: i32) -> (i32, i32) {
    %c0_i32 = arith.constant 0 : i32
    %c0_i32_0 = arith.constant 0 : i32
    %c0_i32_1 = arith.constant 0 : i32
    return %c0_i32, %c0_i32_0 : i32, i32
  }
  func.func @transform_2(%arg0: i32) -> (i32, i32) {
    %c0_i32 = arith.constant 0 : i32
    %c0_i32_0 = arith.constant 0 : i32
    %c0_i32_1 = arith.constant 0 : i32
    return %c0_i32, %c0_i32_0 : i32, i32
  }
  func.func @transform_3(%arg0: i32) -> (i32, i32) {
    %c0_i32 = arith.constant 0 : i32
    %c0_i32_0 = arith.constant 0 : i32
    return %arg0, %c0_i32 : i32, i32
  }
  func.func @transform_4(%arg0: i32) -> (i32, i32) {
    %c0_i32 = arith.constant 0 : i32
    %c0_i32_0 = arith.constant 0 : i32
    return %arg0, %c0_i32 : i32, i32
  }
  func.func @transform_5(%arg0: i32) -> (i32, i32) {
    %c0_i32 = arith.constant 0 : i32
    %c0_i32_0 = arith.constant 0 : i32
    return %arg0, %c0_i32 : i32, i32
  }
  func.func @transform_6(%arg0: i32) -> (i32, i32) {
    %c0_i32 = arith.constant 0 : i32
    %c0_i32_0 = arith.constant 0 : i32
    return %arg0, %c0_i32 : i32, i32
  }
}

module attributes {stable_mosaic.version = 11 : i64} {
  func.func @_biaffine_kernel(%arg0: i32, %arg1: i32, %arg2: i32, %arg3: memref<1x8x128xbf16, #tpu.memory_space<vmem>>, %arg4: memref<1x8x128xbf16, #tpu.memory_space<vmem>>, %arg5: memref<128x512xbf16, #tpu.memory_space<vmem>>, %arg6: memref<4x128xf32, #tpu.memory_space<vmem>>, %arg7: memref<4x128xbf16, #tpu.memory_space<vmem>>, %arg8: memref<4x1xf32, #tpu.memory_space<vmem>>, %arg9: memref<4x8x8xbf16, #tpu.memory_space<vmem>>, %arg10: memref<4x8x128xbf16, #tpu.memory_space<vmem>>, %arg11: memref<4x8xf32, #tpu.memory_space<vmem>>) attributes {dimension_semantics = [#tpu.dimension_semantics<parallel>, #tpu.dimension_semantics<parallel>, #tpu.dimension_semantics<arbitrary>], iteration_bounds = array<i64: 2, 1, 1>, scalar_prefetch = 0 : i64, scratch_operands = 2 : i64, tpu.core_type = #tpu.core_type<tc>, window_params = [{transform_indices = @transform_0, window_bounds = array<i64: 1, 8, 128>}, {transform_indices = @transform_1, window_bounds = array<i64: 1, 8, 128>}, {pipeline_mode = #tpu.pipeline_mode<synchronous>, transform_indices = @transform_2, window_bounds = array<i64: 128, 512>}, {pipeline_mode = #tpu.pipeline_mode<synchronous>, transform_indices = @transform_3, window_bounds = array<i64: 4, 128>}, {pipeline_mode = #tpu.pipeline_mode<synchronous>, transform_indices = @transform_4, window_bounds = array<i64: 4, 128>}, {pipeline_mode = #tpu.pipeline_mode<synchronous>, transform_indices = @transform_5, window_bounds = array<i64: 4, 1>}, {transform_indices = @transform_6, window_bounds = array<i64: 4, 8, 8>}]} {
    %c0_i32 = arith.constant 0 : i32
    %0 = arith.cmpi eq, %arg2, %c0_i32 : i32
    %1 = arith.extui %0 : i1 to i32
    %c0_i32_0 = arith.constant 0 : i32
    %2 = arith.cmpi ne, %1, %c0_i32_0 : i32
    scf.if %2 {
      %c0_5 = arith.constant 0 : index
      %c0_6 = arith.constant 0 : index
      %c0_7 = arith.constant 0 : index
      %7 = vector.load %arg3[%c0_5, %c0_6, %c0_7] : memref<1x8x128xbf16, #tpu.memory_space<vmem>>, vector<1x8x128xbf16>
      %8 = vector.shape_cast %7 : vector<1x8x128xbf16> to vector<8x128xbf16>
      %c0_8 = arith.constant 0 : index
      %c0_9 = arith.constant 0 : index
      %9 = vector.load %arg5[%c0_8, %c0_9] : memref<128x512xbf16, #tpu.memory_space<vmem>>, vector<128x512xbf16>
      %cst = arith.constant dense<0.000000e+00> : vector<8x512xf32>
      %10 = tpu.matmul %8, %9, %cst {dimension_numbers = #tpu.dot_dimension_numbers<[1], [0], [0], [1], [0, 0, 1, 1], [], []>} : vector<8x128xbf16>, vector<128x512xbf16>, vector<8x512xf32> -> vector<8x512xf32>
      %11 = vector.extract_strided_slice %10 {offsets = [0, 0], sizes = [8, 128], strides = [1, 1]} : vector<8x512xf32> to vector<8x128xf32>
      %12 = arith.truncf %11 : vector<8x128xf32> to vector<8x128xbf16>
      %c0_10 = arith.constant 0 : index
      %c0_11 = arith.constant 0 : index
      %c0_12 = arith.constant 0 : index
      %13 = vector.load %arg10[%c0_10, %c0_11, %c0_12] : memref<4x8x128xbf16, #tpu.memory_space<vmem>>, vector<1x8x128xbf16>
      %14 = vector.shape_cast %13 : vector<1x8x128xbf16> to vector<8x128xbf16>
      %15 = vector.shape_cast %12 : vector<8x128xbf16> to vector<1x8x128xbf16>
      tpu.vector_store %arg10[%c0_10, %c0_11, %c0_12], %15 {strides = array<i32>} : memref<4x8x128xbf16, #tpu.memory_space<vmem>>, vector<1x8x128xbf16>,
      %16 = vector.extract_strided_slice %10 {offsets = [0, 128], sizes = [8, 128], strides = [1, 1]} : vector<8x512xf32> to vector<8x128xf32>
      %17 = arith.truncf %16 : vector<8x128xf32> to vector<8x128xbf16>
      %c1 = arith.constant 1 : index
      %c0_13 = arith.constant 0 : index
      %c0_14 = arith.constant 0 : index
      %18 = vector.load %arg10[%c1, %c0_13, %c0_14] : memref<4x8x128xbf16, #tpu.memory_space<vmem>>, vector<1x8x128xbf16>
      %19 = vector.shape_cast %18 : vector<1x8x128xbf16> to vector<8x128xbf16>
      %20 = vector.shape_cast %17 : vector<8x128xbf16> to vector<1x8x128xbf16>
      tpu.vector_store %arg10[%c1, %c0_13, %c0_14], %20 {strides = array<i32>} : memref<4x8x128xbf16, #tpu.memory_space<vmem>>, vector<1x8x128xbf16>,
      %21 = vector.extract_strided_slice %10 {offsets = [0, 256], sizes = [8, 128], strides = [1, 1]} : vector<8x512xf32> to vector<8x128xf32>
      %22 = arith.truncf %21 : vector<8x128xf32> to vector<8x128xbf16>
      %c2 = arith.constant 2 : index
      %c0_15 = arith.constant 0 : index
      %c0_16 = arith.constant 0 : index
      %23 = vector.load %arg10[%c2, %c0_15, %c0_16] : memref<4x8x128xbf16, #tpu.memory_space<vmem>>, vector<1x8x128xbf16>
      %24 = vector.shape_cast %23 : vector<1x8x128xbf16> to vector<8x128xbf16>
      %25 = vector.shape_cast %22 : vector<8x128xbf16> to vector<1x8x128xbf16>
      tpu.vector_store %arg10[%c2, %c0_15, %c0_16], %25 {strides = array<i32>} : memref<4x8x128xbf16, #tpu.memory_space<vmem>>, vector<1x8x128xbf16>,
      %26 = vector.extract_strided_slice %10 {offsets = [0, 384], sizes = [8, 128], strides = [1, 1]} : vector<8x512xf32> to vector<8x128xf32>
      %27 = arith.truncf %26 : vector<8x128xf32> to vector<8x128xbf16>
      %c3 = arith.constant 3 : index
      %c0_17 = arith.constant 0 : index
      %c0_18 = arith.constant 0 : index
      %28 = vector.load %arg10[%c3, %c0_17, %c0_18] : memref<4x8x128xbf16, #tpu.memory_space<vmem>>, vector<1x8x128xbf16>
      %29 = vector.shape_cast %28 : vector<1x8x128xbf16> to vector<8x128xbf16>
      %30 = vector.shape_cast %27 : vector<8x128xbf16> to vector<1x8x128xbf16>
      tpu.vector_store %arg10[%c3, %c0_17, %c0_18], %30 {strides = array<i32>} : memref<4x8x128xbf16, #tpu.memory_space<vmem>>, vector<1x8x128xbf16>,
      %c0_19 = arith.constant 0 : index
      %c0_20 = arith.constant 0 : index
      %31 = vector.load %arg7[%c0_19, %c0_20] : memref<4x128xbf16, #tpu.memory_space<vmem>>, vector<4x128xbf16>
      %cst_21 = arith.constant dense<0.000000e+00> : vector<4x8xf32>
      %32 = tpu.matmul %31, %8, %cst_21 {dimension_numbers = #tpu.dot_dimension_numbers<[1], [1], [0], [0], [0, 0, 1, 0], [], []>} : vector<4x128xbf16>, vector<8x128xbf16>, vector<4x8xf32> -> vector<4x8xf32>
      %c0_22 = arith.constant 0 : index
      %c0_23 = arith.constant 0 : index
      %33 = vector.load %arg8[%c0_22, %c0_23] : memref<4x1xf32, #tpu.memory_space<vmem>>, vector<4x1xf32>
      %34 = vector.broadcast %33 : vector<4x1xf32> to vector<4x8xf32>
      %35 = arith.addf %32, %34 : vector<4x8xf32>
      %c0_24 = arith.constant 0 : index
      %c0_25 = arith.constant 0 : index
      %36 = vector.load %arg11[%c0_24, %c0_25] : memref<4x8xf32, #tpu.memory_space<vmem>>, vector<4x8xf32>
      tpu.vector_store %arg11[%c0_24, %c0_25], %35 {strides = array<i32>} : memref<4x8xf32, #tpu.memory_space<vmem>>, vector<4x8xf32>,
    } else {
    }
    %c0 = arith.constant 0 : index
    %c0_1 = arith.constant 0 : index
    %c0_2 = arith.constant 0 : index
    %3 = vector.load %arg4[%c0, %c0_1, %c0_2] : memref<1x8x128xbf16, #tpu.memory_space<vmem>>, vector<1x8x128xbf16>
    %4 = vector.shape_cast %3 : vector<1x8x128xbf16> to vector<8x128xbf16>
    %5 = arith.extf %4 : vector<8x128xbf16> to vector<8x128xf32>
    %c0_i32_3 = arith.constant 0 : i32
    %c4_i32 = arith.constant 4 : i32
    %6 = arith.addi %c0_i32_3, %c4_i32 : i32
    %c1_i32 = arith.constant 1 : i32
    scf.for %arg12 = %c0_i32_3 to %6 step %c1_i32  : i32 {
      %7 = arith.index_cast %arg12 : i32 to index
      %c0_5 = arith.constant 0 : index
      %c0_6 = arith.constant 0 : index
      %8 = vector.load %arg10[%7, %c0_5, %c0_6] : memref<4x8x128xbf16, #tpu.memory_space<vmem>>, vector<1x8x128xbf16>
      %9 = vector.shape_cast %8 : vector<1x8x128xbf16> to vector<8x128xbf16>
      %cst = arith.constant dense<0.000000e+00> : vector<8x8xf32>
      %10 = tpu.matmul %4, %9, %cst {dimension_numbers = #tpu.dot_dimension_numbers<[1], [1], [0], [0], [0, 0, 1, 0], [], []>} : vector<8x128xbf16>, vector<8x128xbf16>, vector<8x8xf32> -> vector<8x8xf32>
      %11 = arith.index_cast %arg12 : i32 to index
      %c0_7 = arith.constant 0 : index
      %12 = vector.load %arg6[%11, %c0_7] : memref<4x128xf32, #tpu.memory_space<vmem>>, vector<1x128xf32>
      %cst_8 = arith.constant dense<0.000000e+00> : vector<8x1xf32>
      %13 = tpu.matmul %5, %12, %cst_8 {dimension_numbers = #tpu.dot_dimension_numbers<[1], [1], [0], [0], [0, 0, 1, 0], [], []>} : vector<8x128xf32>, vector<1x128xf32>, vector<8x1xf32> -> vector<8x1xf32>
      %14 = vector.broadcast %13 : vector<8x1xf32> to vector<8x8xf32>
      %15 = arith.addf %10, %14 : vector<8x8xf32>
      %16 = arith.index_cast %arg12 : i32 to index
      %c0_9 = arith.constant 0 : index
      %17 = vector.load %arg11[%16, %c0_9] : memref<4x8xf32, #tpu.memory_space<vmem>>, vector<1x8xf32>
      %18 = vector.broadcast %17 : vector<1x8xf32> to vector<8x8xf32>
      %19 = arith.addf %15, %18 : vector<8x8xf32>
      %20 = arith.truncf %19 : vector<8x8xf32> to vector<8x8xbf16>
      %21 = arith.index_cast %arg12 : i32 to index
      %c0_10 = arith.constant 0 : index
      %c0_11 = arith.constant 0 : index
      %22 = vector.load %arg9[%21, %c0_10, %c0_11] : memref<4x8x8xbf16, #tpu.memory_space<vmem>>, vector<1x8x8xbf16>
      %23 = vector.shape_cast %22 : vector<1x8x8xbf16> to vector<8x8xbf16>
      %24 = vector.shape_cast %20 : vector<8x8xbf16> to vector<1x8x8xbf16>
      tpu.vector_store %arg9[%21, %c0_10, %c0_11], %24 {strides = array<i32>} : memref<4x8x8xbf16, #tpu.memory_space<vmem>>, vector<1x8x8xbf16>,
    }
    %c4_i32_4 = arith.constant 4 : i32
    return
  }
  func.func @transform_0(%arg0: i32, %arg1: i32, %arg2: i32) -> (i32, i32, i32) {
    %c0_i32 = arith.constant 0 : i32
    %c0_i32_0 = arith.constant 0 : i32
    return %arg0, %arg1, %c0_i32 : i32, i32, i32
  }
  func.func @transform_1(%arg0: i32, %arg1: i32, %arg2: i32) -> (i32, i32, i32) {
    %c0_i32 = arith.constant 0 : i32
    %c0_i32_0 = arith.constant 0 : i32
    return %arg0, %arg2, %c0_i32 : i32, i32, i32
  }
  func.func @transform_2(%arg0: i32, %arg1: i32, %arg2: i32) -> (i32, i32) {
    %c0_i32 = arith.constant 0 : i32
    %c0_i32_0 = arith.constant 0 : i32
    %c0_i32_1 = arith.constant 0 : i32
    return %c0_i32, %c0_i32_0 : i32, i32
  }
  func.func @transform_3(%arg0: i32, %arg1: i32, %arg2: i32) -> (i32, i32) {
    %c0_i32 = arith.constant 0 : i32
    %c0_i32_0 = arith.constant 0 : i32
    %c0_i32_1 = arith.constant 0 : i32
    return %c0_i32, %c0_i32_0 : i32, i32
  }
  func.func @transform_4(%arg0: i32, %arg1: i32, %arg2: i32) -> (i32, i32) {
    %c0_i32 = arith.constant 0 : i32
    %c0_i32_0 = arith.constant 0 : i32
    %c0_i32_1 = arith.constant 0 : i32
    return %c0_i32, %c0_i32_0 : i32, i32
  }
  func.func @transform_5(%arg0: i32, %arg1: i32, %arg2: i32) -> (i32, i32) {
    %c0_i32 = arith.constant 0 : i32
    %c0_i32_0 = arith.constant 0 : i32
    %c0_i32_1 = arith.constant 0 : i32
    return %c0_i32, %c0_i32_0 : i32, i32
  }
  func.func @transform_6(%arg0: i32, %arg1: i32, %arg2: i32) -> (i32, i32, i32) {
    %c0_i32 = arith.constant 0 : i32
    return %arg0, %arg2, %arg1 : i32, i32, i32
  }
}

module attributes {stable_mosaic.version = 11 : i64} {
  func.func @_biaffine_kernel(%arg0: i32, %arg1: i32, %arg2: i32, %arg3: memref<1x8x128xbf16, #tpu.memory_space<vmem>>, %arg4: memref<1x8x128xbf16, #tpu.memory_space<vmem>>, %arg5: memref<128x128xbf16, #tpu.memory_space<vmem>>, %arg6: memref<1x128xf32, #tpu.memory_space<vmem>>, %arg7: memref<1x128xbf16, #tpu.memory_space<vmem>>, %arg8: memref<1x1xf32, #tpu.memory_space<vmem>>, %arg9: memref<1x8x8xf32, #tpu.memory_space<vmem>>, %arg10: memref<1x8x128xbf16, #tpu.memory_space<vmem>>, %arg11: memref<1x8xf32, #tpu.memory_space<vmem>>) attributes {dimension_semantics = [#tpu.dimension_semantics<parallel>, #tpu.dimension_semantics<parallel>, #tpu.dimension_semantics<arbitrary>], iteration_bounds = array<i64: 2, 1, 1>, scalar_prefetch = 0 : i64, scratch_operands = 2 : i64, tpu.core_type = #tpu.core_type<tc>, window_params = [{transform_indices = @transform_0, window_bounds = array<i64: 1, 8, 128>}, {transform_indices = @transform_1, window_bounds = array<i64: 1, 8, 128>}, {pipeline_mode = #tpu.pipeline_mode<synchronous>, transform_indices = @transform_2, window_bounds = array<i64: 128, 128>}, {pipeline_mode = #tpu.pipeline_mode<synchronous>, transform_indices = @transform_3, window_bounds = array<i64: 1, 128>}, {pipeline_mode = #tpu.pipeline_mode<synchronous>, transform_indices = @transform_4, window_bounds = array<i64: 1, 128>}, {pipeline_mode = #tpu.pipeline_mode<synchronous>, transform_indices = @transform_5, window_bounds = array<i64: 1, 1>}, {transform_indices = @transform_6, window_bounds = array<i64: 1, 8, 8>}]} {
    %c0_i32 = arith.constant 0 : i32
    %0 = arith.cmpi eq, %arg2, %c0_i32 : i32
    %1 = arith.extui %0 : i1 to i32
    %c0_i32_0 = arith.constant 0 : i32
    %2 = arith.cmpi ne, %1, %c0_i32_0 : i32
    scf.if %2 {
      %c0_10 = arith.constant 0 : index
      %c0_11 = arith.constant 0 : index
      %c0_12 = arith.constant 0 : index
      %19 = vector.load %arg3[%c0_10, %c0_11, %c0_12] : memref<1x8x128xbf16, #tpu.memory_space<vmem>>, vector<1x8x128xbf16>
      %20 = vector.shape_cast %19 : vector<1x8x128xbf16> to vector<8x128xbf16>
      %c0_13 = arith.constant 0 : index
      %c0_14 = arith.constant 0 : index
      %21 = vector.load %arg5[%c0_13, %c0_14] : memref<128x128xbf16, #tpu.memory_space<vmem>>, vector<128x128xbf16>
      %cst_15 = arith.constant dense<0.000000e+00> : vector<8x128xf32>
      %22 = tpu.matmul %20, %21, %cst_15 {dimension_numbers = #tpu.dot_dimension_numbers<[1], [0], [0], [1], [0, 0, 1, 1], [], []>} : vector<8x128xbf16>, vector<128x128xbf16>, vector<8x128xf32> -> vector<8x128xf32>
      %23 = arith.truncf %22 : vector<8x128xf32> to vector<8x128xbf16>
      %c0_16 = arith.constant 0 : index
      %c0_17 = arith.constant 0 : index
      %c0_18 = arith.constant 0 : index
      %24 = vector.load %arg10[%c0_16, %c0_17, %c0_18] : memref<1x8x128xbf16, #tpu.memory_space<vmem>>, vector<1x8x128xbf16>
      %25 = vector.shape_cast %24 : vector<1x8x128xbf16> to vector<8x128xbf16>
      %26 = vector.shape_cast %23 : vector<8x128xbf16> to vector<1x8x128xbf16>
      tpu.vector_store %arg10[%c0_16, %c0_17, %c0_18], %26 {strides = array<i32>} : memref<1x8x128xbf16, #tpu.memory_space<vmem>>, vector<1x8x128xbf16>,
    } else {
    }
    %c0 = arith.constant 0 : index
    %c0_1 = arith.constant 0 : index
    %c0_2 = arith.constant 0 : index
    %3 = vector.load %arg4[%c0, %c0_1, %c0_2] : memref<1x8x128xbf16, #tpu.memory_space<vmem>>, vector<1x8x128xbf16>
    %4 = vector.shape_cast %3 : vector<1x8x128xbf16> to vector<8x128xbf16>
    %5 = arith.extf %4 : vector<8x128xbf16> to vector<8x128xf32>
    %c0_i32_3 = arith.constant 0 : i32
    %6 = arith.index_cast %c0_i32_3 : i32 to index
    %c0_4 = arith.constant 0 : index
    %c0_5 = arith.constant 0 : index
    %7 = vector.load %arg10[%6, %c0_4, %c0_5] : memref<1x8x128xbf16, #tpu.memory_space<vmem>>, vector<1x8x128xbf16>
    %8 = vector.shape_cast %7 : vector<1x8x128xbf16> to vector<8x128xbf16>
    %cst = arith.constant dense<0.000000e+00> : vector<8x8xf32>
    %9 = tpu.matmul %4, %8, %cst {dimension_numbers = #tpu.dot_dimension_numbers<[1], [1], [0], [0], [0, 0, 1, 0], [], []>} : vector<8x128xbf16>, vector<8x128xbf16>, vector<8x8xf32> -> vector<8x8xf32>
    %10 = arith.index_cast %c0_i32_3 : i32 to index
    %c0_6 = arith.constant 0 : index
    %11 = vector.load %arg6[%10, %c0_6] : memref<1x128xf32, #tpu.memory_space<vmem>>, vector<1x128xf32>
    %cst_7 = arith.constant dense<0.000000e+00> : vector<8x1xf32>
    %12 = tpu.matmul %5, %11, %cst_7 {dimension_numbers = #tpu.dot_dimension_numbers<[1], [1], [0], [0], [0, 0, 1, 0], [], []>} : vector<8x128xf32>, vector<1x128xf32>, vector<8x1xf32> -> vector<8x1xf32>
    %13 = vector.broadcast %12 : vector<8x1xf32> to vector<8x8xf32>
    %14 = arith.addf %9, %13 : vector<8x8xf32>
    %15 = arith.index_cast %c0_i32_3 : i32 to index
    %c0_8 = arith.constant 0 : index
    %c0_9 = arith.constant 0 : index
    %16 = vector.load %arg9[%15, %c0_8, %c0_9] : memref<1x8x8xf32, #tpu.memory_space<vmem>>, vector<1x8x8xf32>
    %17 = vector.shape_cast %16 : vector<1x8x8xf32> to vector<8x8xf32>
    %18 = vector.shape_cast %14 : vector<8x8xf32> to vector<1x8x8xf32>
    tpu.vector_store %arg9[%15, %c0_8, %c0_9], %18 {strides = array<i32>} : memref<1x8x8xf32, #tpu.memory_space<vmem>>, vector<1x8x8xf32>,
    %c1_i32 = arith.constant 1 : i32
    return
  }
  func.func @transform_0(%arg0: i32, %arg1: i32, %arg2: i32) -> (i32, i32, i32) {
    %c0_i32 = arith.constant 0 : i32
    %c0_i32_0 = arith.constant 0 : i32
    return %arg0, %arg1, %c0_i32 : i32, i32, i32
  }
  func.func @transform_1(%arg0: i32, %arg1: i32, %arg2: i32) -> (i32, i32, i32) {
    %c0_i32 = arith.constant 0 : i32
    %c0_i32_0 = arith.constant 0 : i32
    return %arg0, %arg2, %c0_i32 : i32, i32, i32
  }
  func.func @transform_2(%arg0: i32, %arg1: i32, %arg2: i32) -> (i32, i32) {
    %c0_i32 = arith.constant 0 : i32
    %c0_i32_0 = arith.constant 0 : i32
    %c0_i32_1 = arith.constant 0 : i32
    return %c0_i32, %c0_i32_0 : i32, i32
  }
  func.func @transform_3(%arg0: i32, %arg1: i32, %arg2: i32) -> (i32, i32) {
    %c0_i32 = arith.constant 0 : i32
    %c0_i32_0 = arith.constant 0 : i32
    %c0_i32_1 = arith.constant 0 : i32
    return %c0_i32, %c0_i32_0 : i32, i32
  }
  func.func @transform_4(%arg0: i32, %arg1: i32, %arg2: i32) -> (i32, i32) {
    %c0_i32 = arith.constant 0 : i32
    %c0_i32_0 = arith.constant 0 : i32
    %c0_i32_1 = arith.constant 0 : i32
    return %c0_i32, %c0_i32_0 : i32, i32
  }
  func.func @transform_5(%arg0: i32, %arg1: i32, %arg2: i32) -> (i32, i32) {
    %c0_i32 = arith.constant 0 : i32
    %c0_i32_0 = arith.constant 0 : i32
    %c0_i32_1 = arith.constant 0 : i32
    return %c0_i32, %c0_i32_0 : i32, i32
  }
  func.func @transform_6(%arg0: i32, %arg1: i32, %arg2: i32) -> (i32, i32, i32) {
    %c0_i32 = arith.constant 0 : i32
    return %arg0, %arg2, %arg1 : i32, i32, i32
  }
}

</mosaic_0001>

<bundles_post_ra>
// kernel: a_call__.3
= control target key start
LH: loop header
LB: loop body
LE: loop exit
PB: predicated region body
PF: predicated region fallthrough
CT: control target
= control target key end

     0   :  { %12 = vsyncpa [#allocation3], 0  ;;  %s448_s0 = inlined_call_operand.hbm [shape: f32[16,32], index: 0, kind: input, shape index: {}]   ;;  %s449_s1 = inlined_call_operand.hbm [shape: bf16[32,512], index: 1, kind: input, shape index: {}]   ;;  %s450_s2 = inlined_call_operand.vmem [shape: f32[1,512], index: 2, kind: input, shape index: {}]   ;;  %s451_s3 = inlined_call_operand.vmem [shape: bf16[16,128], index: 3, kind: output, shape index: {0}]   ;;  %s452_s4 = inlined_call_operand.vmem [shape: bf16[16,128], index: 4, kind: output, shape index: {1}]   ;;  %s453_s5 = inlined_call_operand.vmem [shape: bf16[16,128], index: 5, kind: output, shape index: {2}]   ;;  %s454_s6 = inlined_call_operand.vmem [shape: bf16[16,128], index: 6, kind: output, shape index: {3}]  }
   0x1   :  { %13 = vsyncpa [#allocation5], 0  ;;  %s385_s21 = smov [#allocation2]  }
   0x2   :  { %s19_s22 = sshll.u32 %s385_s21, 4  ;;  %s20_s22 = int_to_ptr.vmem [resolvable:$true] %s19_s22 }
   0x3   :  { %s349_s23 = scalar_lea.vmem %s20_s22, 256  ;;  %p354_p1 = scmp.lt.s32.totalorder %s20_s22, %s20_s22 }
   0x4   :  { %p350_p0 = scmp.ne.s32.totalorder %s20_s22, %s349_s23  ;;  %p355_p2 = scmp.lt.s32.totalorder %s349_s23, %s349_s23 }
   0x6   :  { %p356_p3 = por %p355_p2, %p354_p1 }
   0x8   :  { %p357_p4 = pnand %p356_p3, %p350_p0 }
   0xa   :  { %360 = shalt.err (!%p357_p4)
}
   0xb   :  { %s386_s24 = smov 128   ;;  %s387_s25 = smov 8  }
   0xc   :  { %25 = dma.hbm_to_vmem [thread:$0]  %s448_s0, 256, %s20_s22, [#allocation3], %s386_s24, %s386_s24, %s387_s25  }
   0xd   :  { %s388_s28 = smov [#allocation4]  }
   0xe   :  { %s31_s29 = sshll.u32 %s388_s28, 4  ;;  %s32_s29 = int_to_ptr.vmem [resolvable:$true] %s31_s29 }
   0xf   :  { %s369_s30 = scalar_lea.vmem %s32_s29, 1024  ;;  %p374_p6 = scmp.lt.s32.totalorder %s32_s29, %s32_s29 }
  0x10   :  { %p370_p5 = scmp.ne.s32.totalorder %s32_s29, %s369_s30  ;;  %p375_p7 = scmp.lt.s32.totalorder %s369_s30, %s369_s30 }
  0x12   :  { %p376_p8 = por %p375_p7, %p374_p6 }
  0x14   :  { %p377_p9 = pnand %p376_p8, %p370_p5 }
  0x16   :  { %380 = shalt.err (!%p377_p9)
}
  0x17   :  { %s389_s7 = smov 256   ;;  %s390_s8 = smov 16  }
  0x18   :  { %37 = dma.hbm_to_vmem [thread:$0]  %s449_s1, 1024, %s32_s29, [#allocation5], %s389_s7, %s389_s7, %s390_s8  }
  0x19   :  { %381 = dma.done.wait [#allocation3], 256  }
  0x1a   :  { %382 = vsyncadd [#allocation3], 4294967040 }
  0x1b   :  { %383 = dma.done.wait [#allocation5], 1024  }
  0x1c   :  { %384 = vsyncadd [#allocation5], 4294966272  ;;  %v391_v0 = vmov 0   ;;  %v329_v1 = vld [vmem:[#allocation4 + $0x24] ss:$16 sps:$4 sm:$0xff]   ;;  %v48_v10 = vld [vmem:[#allocation2 + $0x8] sm:$0xff]  ;;  %v60_v12 = vlaneseq }
  0x1d   :  { %156 = vmatprep.mubr.bf16.mxu0 %v391_v0  ;;  %199 = vmatprep.mubr.bf16.mxu1 %v391_v0  ;;  %v331_v2 = vld [vmem:[#allocation4 + $0x2c] ss:$16 sps:$4 sm:$0xff]   ;;  %v333_v3 = vld [vmem:[#allocation4 + $0x20] ss:$16 sps:$4 sm:$0xff]   ;;  %v334_v4 = vld [vmem:[#allocation4 + $0x28] ss:$16 sps:$4 sm:$0xff]  }
  0x1e   :  { %136 = vmatprep.subr.bf16.mxu0 %v329_v1  ;;  %179 = vmatprep.subr.bf16.mxu1 %v331_v2  ;;  %v335_v5 = vld [vmem:[#allocation4 + $0x4] ss:$16 sps:$4 sm:$0xff]   ;;  %v337_v6 = vld [vmem:[#allocation4 + $0xc] ss:$16 sps:$4 sm:$0xff]   ;;  %v339_v7 = vld [vmem:[#allocation4] ss:$16 sps:$4 sm:$0xff]  }
  0x1f   :  { %137 = vmatpush1.bf16.msra.mxu0 %v333_v3  ;;  %180 = vmatpush1.bf16.msra.mxu1 %v334_v4  ;;  %v340_v8 = vld [vmem:[#allocation4 + $0x8] ss:$16 sps:$4 sm:$0xff]   ;;  %v47_v9 = vld [vmem:[#allocation2] sm:$0xff]  ;;  %vm120_vm0 = vcmask 261120   ;;  %v61_v13 = vshrl.u32 %v60_v12, 7 }
  0x20   :  { %138 = vmatprep.subr.bf16.mxu0 %v335_v5  ;;  %181 = vmatprep.subr.bf16.mxu1 %v337_v6  ;;  %v49_v11 = vpack.c.bf16 %v48_v10, %v47_v9  ;;  %v58_v16 = vld [vmem:[%s450_s2] sm:$0xf] }
  0x21   :  { %v62_v14 = vsub.s32 0, %v61_v13  ;;  %v70_v15 = vsub.s32 2, %v61_v13  ;;  %v66_v17 = vsub.s32 1, %v61_v13  ;;  %v74_v18 = vsub.s32 3, %v61_v13 }
  0x23   :  { %139 = vmatpush1.bf16.msra.mxu0 %v339_v7  ;;  %182 = vmatpush1.bf16.msra.mxu1 %v340_v8  ;;  %v63_v19 = vrot.slane %v58_v16, %v62_v14  ;;  %v71_v20 = vrot.slane %v58_v16, %v70_v15  ;;  %v67_v23 = vrot.slane %v58_v16, %v66_v17 }
  0x24   :  { %v75_v24 = vrot.slane %v58_v16, %v74_v18 }
  0x26   :  { %284 = vmatmul.mubr.msk.bf16.vlgmr.msra.gmra.mxu0 %vm120_vm0, %v49_v11  ;;  %285 = vmatmul.mubr.msk.bf16.vlgmr.msra.gmra.mxu1 %vm120_vm0, %v49_v11 }
  0xe6   :  { %v158_v21 = vpop.f32.mrf.mxu0  ;;  %v201_v22 = vpop.f32.mrf.mxu1 }
  0xe7   :  { %v159_v25 = vadd.f32 %v158_v21, %v63_v19  ;;  %v202_v26 = vadd.f32 %v201_v22, %v71_v20 }
  0xe8   :  { %v160_v27 = vpop.f32.mrf.mxu0  ;;  %v203_v28 = vpop.f32.mrf.mxu1 }
  0xe9   :  { %v161_v29 = vadd.f32 %v160_v27, %v67_v23  ;;  %v204_v30 = vadd.f32 %v203_v28, %v75_v24  ;;  %v210_v35 = vmax.f32 %v159_v25, 0.0  ;;  %v212_v36 = vmax.f32 %v202_v26, 0.0 }
  0xea   :  { %v162_v31 = vpop.f32.mrf.mxu0  ;;  %v205_v32 = vpop.f32.mrf.mxu1 }
  0xeb   :  { %v163_v33 = vadd.f32 %v162_v31, %v63_v19  ;;  %v206_v34 = vadd.f32 %v205_v32, %v71_v20  ;;  %v211_v43 = vmax.f32 %v161_v29, 0.0  ;;  %v213_v44 = vmax.f32 %v204_v30, 0.0 }
  0xec   :  { %v164_v37 = vpop.f32.mrf.mxu0  ;;  %v207_v38 = vpop.f32.mrf.mxu1 }
  0xed   :  { %v214_v39 = vmax.f32 %v163_v33, 0.0  ;;  %v216_v40 = vmax.f32 %v206_v34, 0.0  ;;  %v165_v41 = vadd.f32 %v164_v37, %v67_v23  ;;  %v208_v42 = vadd.f32 %v207_v38, %v75_v24 }
  0xef   :  { %v305_v45 = vpack.c.bf16 %v214_v39, %v210_v35  ;;  %v315_v46 = vpack.c.bf16 %v216_v40, %v212_v36  ;;  %v215_v47 = vmax.f32 %v165_v41, 0.0  ;;  %v217_v48 = vmax.f32 %v208_v42, 0.0 }
  0xf1   :  { %306 = vst [vmem:[%s451_s3] sm:$0xff] %v305_v45   ;;  %316 = vst [vmem:[%s453_s5] sm:$0xff] %v315_v46   ;;  %v310_v49 = vpack.c.bf16 %v215_v47, %v211_v43  ;;  %v320_v50 = vpack.c.bf16 %v217_v48, %v213_v44 }
  0xf3   :  { %311 = vst [vmem:[%s452_s4] sm:$0xff] %v310_v49   ;;  %321 = vst [vmem:[%s454_s6] sm:$0xff] %v320_v50  }
  0xf4   :  { %274 = vsyncpa [#allocation3], 1 }
  0xf5   :  { %275 = vsyncpa [#allocation5], 1 }

// kernel: a_call__.4
= control target key start
LH: loop header
LB: loop body
LE: loop exit
PB: predicated region body
PF: predicated region fallthrough
CT: control target
= control target key end

     0   :  { %13 = vsyncpa [#allocation6], 0  ;;  %s964_s0 = inlined_call_operand.vmem [shape: bf16[2,8,128], index: 0, kind: input, shape index: {}]   ;;  %s965_s1 = inlined_call_operand.vmem [shape: bf16[2,8,128], index: 1, kind: input, shape index: {}]   ;;  %s966_s2 = inlined_call_operand.vmem [shape: bf16[128,128], index: 2, kind: input, shape index: {}]   ;;  %s967_s3 = inlined_call_operand.vmem [shape: f32[1,128], index: 3, kind: input, shape index: {}]   ;;  %s968_s4 = inlined_call_operand.vmem [shape: bf16[1,128], index: 4, kind: input, shape index: {}]   ;;  %s969_s5 = inlined_call_operand.<no memory space> [shape: f32[1,1], index: 5, kind: input, shape index: {}]   ;;  %s970_s6 = inlined_call_operand.hbm [shape: f32[2,8,8], index: 6, kind: output, shape index: {}]  }
   0x1   :  { %15 = vsyncpa [#allocation6 + $0x1], 0  ;;  %s823_s21 = smov 0   ;;  %s825_s22 = smov 0  }
   0x2   :  { %s827_s23 = smov 0   ;;  %s829_s24 = smov 0  }
   0x3   :  { %s831_s25 = smov 0   ;;  %s833_s26 = smov 0  }
   0x4 LB: > { %s584_s4 = sadd.s32 4294967295, %s783_s26   ;;  %s585_s5 = sadd.s32 4294967294, %s783_s26   ;;  %s783_s26 = sphi %s833_s26, %s21_s26   ;;  %s779_s25 = sphi %s831_s25, %s977_s25   ;;  %s775_s24 = sphi %s829_s24, %s976_s24   ;;  %s771_s23 = sphi %s827_s23, %s975_s23   ;;  %s767_s22 = sphi %s825_s22, %s974_s22   ;;  %s763_s21 = sphi %s823_s21, %s973_s21  }
   0x5   : > { %s40_s27 = sadd.s32 1, %s779_s25  ;;  %s191_s28 = sadd.s32 1, %s771_s23 }
   0x6   : > { %p42_p0 = scmp.ge.s32.totalorder %s40_s27, 2  ;;  %p201_p1 = scmp.ne.s32.totalorder %s771_s23, %s767_s22 }
   0x7   : > { %p202_p2 = scmp.eq.s32.totalorder %s584_s4, 1  ;;  %p207_p3 = scmp.ne.s32.totalorder %s767_s22, %s763_s21 }
   0x8   : > { %s979_s27 = smov (%p42_p0, %s40_s27), 0  ;;  %p208_p5 = scmp.eq.s32.totalorder %s585_s5, 1 }
   0x9   : > { %p863_p4 = por %p202_p2, %p201_p1  ;;  %s184_s30 = ssub.s32 %s779_s25, %s979_s27 }
   0xa   : > { %p588_p6 = scmp.ge.s32.totalorder %s783_s26, 1  ;;  %p189_p7 = scmp.eq.s32.totalorder %s184_s30, 0 }
   0xb   : > { %p870_p8 = por %p208_p5, %p207_p3  ;;  %p258_p9 = scmp.lt.s32.totalorder %s783_s26, 3 }
   0xc   : > { %s876_s8 = scalar_select %p189_p7, %s771_s23, %s191_s28  }
   0xd   : > { %p259_p10 = pnand %p588_p6, %p258_p9 }
   0xe   : > { %p297_p11 = scmp.lt.s32.totalorder (!%p259_p10), %s775_s24, 1  ;;  %s294_s19 = sand.u32 (!%p259_p10), 1, %s767_s22  }
   0xf   : > { %262 = sbr.rel (%p259_p10) target bundleno = 472 (0x1d8), region = 44  ;;  %s589_s20 = sshll.u32 (!%p259_p10), %s294_s19, 3 }
  0x10   : > { %s296_s5 = scalar_lea.vmem (!%p259_p10), [#allocation5], %s589_s20  ;;  %s479_s11 = scalar_lea.sflag (!%p259_p10), [#allocation6], %s294_s19 }
  0x11   : > { %s494_s28 = sshll.u32 (!%p259_p10), %s296_s5, 4  ;;  %s787_s12 = smov (!%p259_p10), [#allocation5]   ;;  %s920_s28 = int_to_ptr.vmem [resolvable:$true] %s494_s28 }
  0x14   : > { %v699_v0 = vld [vmem:[%s966_s2 + $0x38] sm:$0xff]   ;;  %v785_v1 = vmov 0.0   ;;  %v700_v2 = vld [vmem:[%s966_s2 + $0x30] sm:$0xff]   ;;  %vm786_vm0 = vmmov 0   ;;  %v701_v3 = vld [vmem:[%s966_s2 + $0x28] sm:$0xff]   ;;  %s298_s4 = scalar_select %p297_p11, %s775_s24, 1 }
  0x15   : > { %616 = vmatprep.subr.bf16.mxu0 %v785_v1  ;;  %636 = vmatprep.subr.bf16.mxu1 %v785_v1  ;;  %v702_v4 = vld [vmem:[%s966_s2 + $0x20] sm:$0xff]   ;;  %v703_v5 = vld [vmem:[%s966_s2 + $0x18] sm:$0xff]   ;;  %v704_v6 = vld [vmem:[%s966_s2 + $0x10] sm:$0xff]   ;;  %vm476_vm1 = vcmask 64512  }
  0x16   : > { %617 = vmatpush3.bf16.msra.mxu0 %v699_v0  ;;  %632 = vmatprep.mubr.msk.bf16.mxu0 %vm786_vm0, %v785_v1  ;;  %v705_v7 = vld [vmem:[%s966_s2 + $0x8] sm:$0xff]   ;;  %s590_s30 = sshll.u32 %s298_s4, 2  ;;  %v706_v8 = vld [vmem:[%s966_s2] sm:$0xff]   ;;  %s602_s4 = sshll.u32 %s775_s24, 7 }
  0x17   : > { %618 = vmatprep.subr.bf16.mxu0 %v785_v1  ;;  %638 = vmatprep.mubr.msk.bf16.mxu1 %vm786_vm0, %v785_v1  ;;  %s303_s13 = scalar_lea.vmem %s964_s0, %s590_s30  ;;  %s310_s16 = scalar_lea.vmem %s965_s1, %s590_s30  ;;  %v600_v12 = vld [vmem:[%s967_s3] ss:$0 sm:$0xff] }
  0x18   : > { %v316_v9 = vld [vmem:[%s303_s13] sm:$0xf]  ;;  %s918_s10 = scalar_lea.hbm %s970_s6, %s602_s4  ;;  %s707_s24 = scalar_lea.vmem %s920_s28, 128 }
  0x19   : > { %v423_v10 = vld [vmem:[%s310_s16] sm:$0xf]  ;;  %p708_p12 = scmp.ne.s32.totalorder %s920_s28, %s707_s24  ;;  %s711_s13 = sshll.u32 %s787_s12, 4  ;;  %s712_s13 = int_to_ptr.vmem [resolvable:$false] %s711_s13 }
  0x1a   : > { %619 = vmatpush3.bf16.msra.mxu0 %v700_v2  ;;  %v424_v11 = vunpack.c.l.bf16 %v423_v10  ;;  %s713_s14 = scalar_lea.vmem %s712_s13, 256  ;;  %p714_p1 = scmp.lt.s32.totalorder %s920_s28, %s712_s13 }
  0x1b   : > { %620 = vmatprep.subr.bf16.mxu0 %v785_v1  ;;  %p709_p13 = pnand %p708_p12, %p863_p4  ;;  %p715_p2 = scmp.lt.s32.totalorder %s713_s14, %s707_s24 }
  0x1c   : > { %v433_v13 = vmul.f32 %v600_v12, %v424_v11 }
  0x1d   : > { %p710_p0 = pneg %p709_p13  ;;  %p716_p3 = por %p715_p2, %p714_p1 }
  0x1e   : > { %621 = vmatpush3.bf16.msra.mxu0 %v701_v3  ;;  %434 = vadd.xlane.f32.xlu0 %v433_v13 }
  0x1f   : > { %622 = vmatprep.subr.bf16.mxu0 %v785_v1  ;;  %p717_p5 = pnand %p716_p3, %p710_p0 }
  0x22   : > { %623 = vmatpush3.bf16.msra.mxu0 %v702_v4 }
  0x23   : > { %624 = vmatprep.subr.bf16.mxu0 %v785_v1 }
  0x26   : > { %625 = vmatpush3.bf16.msra.mxu0 %v703_v5 }
  0x27   : > { %626 = vmatprep.subr.bf16.mxu0 %v785_v1 }
  0x2a   : > { %627 = vmatpush3.bf16.msra.mxu0 %v704_v6 }
  0x2b   : > { %628 = vmatprep.subr.bf16.mxu0 %v785_v1 }
  0x2e   : > { %629 = vmatpush3.bf16.msra.mxu0 %v705_v7 }
  0x2f   : > { %630 = vmatprep.subr.bf16.mxu0 %v785_v1 }
  0x32   : > { %631 = vmatpush3.bf16.msra.mxu0 %v706_v8 }
  0x35   : > { %633 = vmatmul.mubr.bf16.vlgmr.msra.gmra.mxu0 %v316_v9 }
  0xa7   : > { %v435_v20 = vpop.xlane.xlu0 %434 }
  0xf5   : > { %v415_v14 = vpop.f32.mrf.mxu0 }
  0xf6   : > { %v421_v15 = vpack.c.bf16 %v415_v14, %v415_v14 }
  0xf7   : > { %v634_v16 = vpop.f32.mrf.mxu0 }
  0xf8   : > { %422 = vst [vmem:[#allocation2] sm:$0xf] %v421_v15 }
  0xf9   : > { %v418_v17 = vpop.f32.mrf.mxu0 }
  0xfb   : > { %v635_v18 = vpop.f32.mrf.mxu0 }
  0xff   : > { %v425_v19 = vld [vmem:[#allocation2] sm:$0xf] }
 0x100   : > { %637 = vmatpush3.bf16.xpose.msra.mxu1 %v425_v19 }
 0x107   : > { %639 = vmatmul.mubr.bf16.vlgmr.msra.gmra.mxu1 %v423_v10 }
 0x1c7   : > { %v470_v21 = vpop.f32.mrf.mxu1 }
 0x1c8   : > { %v471_v22 = vadd.f32 %v470_v21, %v435_v20 }
 0x1c9   : > { %v640_v23 = vpop.f32.mrf.mxu1 }
 0x1ca   : > { %477 = vst.msk [vmem:[%s296_s5] sm:$0xff] %vm476_vm1, %v471_v22 }
 0x1cb   : > { %v473_v24 = vpop.f32.mrf.mxu1 }
 0x1cc   : > { %720 = shalt.err (!%p717_p5)
}
 0x1cd   : > { %s721_s15 = scalar_lea.hbm %s918_s10, 128  ;;  %s725_s18 = scalar_lea.hbm %s970_s6, 256 }
 0x1ce   : > { %p722_p6 = scmp.ne.s32.totalorder %s918_s10, %s721_s15  ;;  %p726_p10 = scmp.lt.s32.totalorder %s918_s10, %s970_s6 }
 0x1cf   : > { %p727_p11 = scmp.lt.s32.totalorder %s725_s18, %s721_s15 }
 0x1d0   : > { %p723_p7 = pnand %p722_p6, %p863_p4 }
 0x1d1   : > { %p728_p12 = por %p727_p11, %p726_p10 }
 0x1d2   : > { %p724_p9 = pneg %p723_p7 }
 0x1d4   : > { %p729_p13 = pnand %p728_p12, %p724_p9 }
 0x1d6   : > { %732 = shalt.err (!%p729_p13)
}
 0x1d7   : > { %642 = dma.vmem_to_hbm [thread:$0]  (%p863_p4), %s920_s28, 128, %s918_s10, %s479_s11   ;;  %v641_v25 = vpop.f32.mrf.mxu1 }
 0x1d8 PF: > { %p648_p0 = scmp.ge.s32.totalorder %s783_s26, 2  ;;  %s506_s4 = sand.u32 1, %s763_s21  }
 0x1d9   : > { %s507_s5 = scalar_lea.sflag [#allocation6], %s506_s4 }
 0x1da   : > { %p645_p1 = pnand %p648_p0, %p870_p8 }
 0x1dc   : > { %p646_p2 = pneg %p645_p1 }
 0x1de   : > { %758 = dma.done.wait (%p646_p2), %s507_s5, 128  }
 0x1df   : > { %760 = vsyncadd (%p646_p2), %s507_s5, 4294967168  ;;  %s21_s26 = sadd.s32 1, %s783_s26   ;;  %s973_s21 = smov %s767_s22 }
 0x1e0   : > { %p18_p3 = scmp.ge.s32.totalorder %s21_s26, 4   ;;  %s974_s22 = smov %s771_s23 }
 0x1e1   : > { %s975_s23 = smov %s876_s8  ;;  %s976_s24 = smov %s779_s25 }
 0x1e2   : > { %s977_s25 = smov %s979_s27  ;;  %20 = sbr.rel (!%p18_p3) target bundleno = 4 (0x4), region = 86 }
 0x1e7   :  { %512 = vsyncpa [#allocation6], 1 }
 0x1e8   :  { %514 = vsyncpa [#allocation6 + $0x1], 1 }

// kernel: a_call__.5
= control target key start
LH: loop header
LB: loop body
LE: loop exit
PB: predicated region body
PF: predicated region fallthrough
CT: control target
= control target key end

     0   :  { %11 = vsyncpa [#allocation5], 0  ;;  %s1159_s21 = smov 0   ;;  %s1161_s22 = smov 0   ;;  %s1250_s0 = inlined_call_operand.vmem [shape: bf16[2,8,128], index: 0, kind: input, shape index: {}]   ;;  %s1251_s1 = inlined_call_operand.vmem [shape: bf16[2,8,128], index: 1, kind: input, shape index: {}]   ;;  %s1252_s2 = inlined_call_operand.hbm [shape: bf16[128,512], index: 2, kind: input, shape index: {}]   ;;  %s1253_s3 = inlined_call_operand.vmem [shape: f32[4,128], index: 3, kind: input, shape index: {}]   ;;  %s1254_s4 = inlined_call_operand.vmem [shape: bf16[4,128], index: 4, kind: input, shape index: {}]   ;;  %s1255_s5 = inlined_call_operand.vmem [shape: f32[4,1], index: 5, kind: input, shape index: {}]   ;;  %s1256_s6 = inlined_call_operand.vmem [shape: bf16[8,8,8], index: 6, kind: output, shape index: {}]  }
   0x1   :  { %s1163_s23 = smov 0  }
   0x2 LB: > { %s880_s24 = sadd.s32 4294967295, %s1110_s23   ;;  %s36_s25 = sadd.s32 1, %s1106_s22  ;;  %s1110_s23 = sphi %s1163_s23, %s17_s23   ;;  %s1106_s22 = sphi %s1161_s22, %s1260_s22   ;;  %s1102_s21 = sphi %s1159_s21, %s1259_s21  }
   0x3   : > { %p38_p0 = scmp.ge.s32.totalorder %s36_s25, 2  ;;  %p882_p1 = scmp.ge.s32.totalorder %s1110_s23, 1 }
   0x4   : > { %p211_p2 = scmp.lt.s32.totalorder %s1110_s23, 3  ;;  %p1184_p4 = scmp.eq.s32.totalorder %s880_s24, 0 }
   0x5   : > { %s1262_s25 = smov (%p38_p0, %s36_s25), 0  ;;  %s1116_s28 = smov [#allocation4]  }
   0x6   : > { %p1180_p3 = pnand %p882_p1, %p211_p2  ;;  %s223_s29 = sshll.u32 %s1116_s28, 4  ;;  %s224_s29 = int_to_ptr.vmem [resolvable:$true] %s223_s29 }
   0x7   : > { %s1065_s30 = scalar_lea.vmem %s224_s29, 4096  ;;  %p1073_p11 = scmp.lt.s32.totalorder %s224_s29, %s224_s29 }
   0x8   : > { %p959_p5 = pneg %p1180_p3  ;;  %p1066_p8 = scmp.ne.s32.totalorder %s224_s29, %s1065_s30 }
   0x9   : > { %p1074_p12 = scmp.lt.s32.totalorder %s1065_s30, %s1065_s30 }
   0xa   : > { %p960_p6 = pnand %p1184_p4, %p959_p5 }
   0xb   : > { %p1075_p13 = por %p1074_p12, %p1073_p11 }
   0xc   : > { %p1056_p7 = pneg %p960_p6 }
   0xe   : > { %p1068_p9 = pnand %p1066_p8, %p1056_p7 }
  0x10   : > { %p1069_p10 = pneg %p1068_p9 }
  0x12   : > { %p1076_p0 = pnand %p1075_p13, %p1069_p10 }
  0x14   : > { %1079 = shalt.err (!%p1076_p0)
}
  0x15   : > { %s1117_s7 = smov 256   ;;  %s1118_s8 = smov 16  }
  0x16   : > { %962 = dma.hbm_to_vmem [thread:$0]  (!%p960_p6), %s1252_s2, 4096, %s224_s29, [#allocation5], %s1117_s7, %s1117_s7, %s1118_s8  }
  0x17   : > { %268 = sbr.rel (%p1180_p3) target bundleno = 480 (0x1e0), region = 44 }
  0x1c   : > { %1097 = dma.done.wait (%p1184_p4), [#allocation5], 4096  }
  0x1d   : > { %1099 = vsyncadd (%p1184_p4), [#allocation5], 4294963200  ;;  %s889_s11 = sshll.u32 %s1102_s21, 2  ;;  %v1119_v0 = vmov 0   ;;  %v1006_v1 = vld [vmem:[#allocation4 + $0xe4] ss:$16 sps:$4 sm:$0xff]  }
  0x1e   : > { %p328_p1 = scmp.lt.s32.totalorder %s889_s11, 7  ;;  %569 = vmatprep.mubr.bf16.mxu0 %v1119_v0  ;;  %610 = vmatprep.mubr.bf16.mxu1 %v1119_v0  ;;  %v1008_v2 = vld [vmem:[#allocation4 + $0xe0] ss:$16 sps:$4 sm:$0xff]   ;;  %v1009_v3 = vld [vmem:[#allocation4 + $0xec] ss:$16 sps:$4 sm:$0xff]   ;;  %p313_p2 = scmp.lt.s32.totalorder %s1102_s21, 1 }
  0x1f   : > { %1005 = vset.pattern.permute.xlu0 %v1119_v0  ;;  %537 = vmatprep.subr.bf16.mxu0 %v1006_v1  ;;  %v1011_v4 = vld [vmem:[#allocation4 + $0xc4] ss:$16 sps:$4 sm:$0xff]   ;;  %v1013_v5 = vld [vmem:[#allocation4 + $0xe8] ss:$16 sps:$4 sm:$0xff]   ;;  %v1014_v6 = vld [vmem:[#allocation4 + $0xc0] ss:$16 sps:$4 sm:$0xff]  }
  0x20   : > { %s1264_s11 = smov (!%p328_p1, %s889_s11), 7  ;;  %538 = vmatpush1.bf16.msra.mxu0 %v1008_v2  ;;  %578 = vmatprep.subr.bf16.mxu1 %v1009_v3  ;;  %v1015_v7 = vld [vmem:[#allocation4 + $0xcc] ss:$16 sps:$4 sm:$0xff]   ;;  %v1017_v8 = vld [vmem:[#allocation4 + $0xa4] ss:$16 sps:$4 sm:$0xff]   ;;  %s1266_s21 = smov (!%p313_p2, %s1102_s21), 1 }
  0x21   : > { %s890_s12 = sshll.u32 %s1264_s11, 2  ;;  %539 = vmatprep.subr.bf16.mxu0 %v1011_v4  ;;  %579 = vmatpush1.bf16.msra.mxu1 %v1013_v5  ;;  %v1019_v9 = vld [vmem:[#allocation4 + $0xc8] ss:$16 sps:$4 sm:$0xff]   ;;  %v1020_v10 = vld [vmem:[#allocation4 + $0xa0] ss:$16 sps:$4 sm:$0xff]   ;;  %s887_s16 = sshll.u32 %s1266_s21, 2 }
  0x22   : > { %s1205_s15 = scalar_lea.vmem %s1256_s6, %s890_s12  ;;  %580 = vmatprep.subr.bf16.mxu1 %v1015_v7  ;;  %v1021_v11 = vld [vmem:[#allocation4 + $0xac] ss:$16 sps:$4 sm:$0xff]   ;;  %v1023_v12 = vld [vmem:[#allocation4 + $0x84] ss:$16 sps:$4 sm:$0xff]   ;;  %v1025_v13 = vld [vmem:[#allocation4 + $0xa8] ss:$16 sps:$4 sm:$0xff]   ;;  %s326_s19 = scalar_lea.vmem %s1251_s1, %s887_s16 }
  0x23   : > { %v1027_v14 = vld [vmem:[#allocation4 + $0x8c] ss:$16 sps:$4 sm:$0xff]   ;;  %v1026_v15 = vld [vmem:[#allocation4 + $0x80] ss:$16 sps:$4 sm:$0xff]   ;;  %v1029_v16 = vld [vmem:[#allocation4 + $0x64] ss:$16 sps:$4 sm:$0xff]   ;;  %s319_s27 = scalar_lea.vmem %s1250_s0, %s887_s16 }
  0x24   : > { %540 = vmatpush1.bf16.msra.mxu0 %v1014_v6  ;;  %v1031_v17 = vld [vmem:[#allocation4 + $0x88] ss:$16 sps:$4 sm:$0xff]   ;;  %v1033_v18 = vld [vmem:[#allocation4 + $0x6c] ss:$16 sps:$4 sm:$0xff]   ;;  %v1032_v19 = vld [vmem:[#allocation4 + $0x60] ss:$16 sps:$4 sm:$0xff]  }
  0x25   : > { %541 = vmatprep.subr.bf16.mxu0 %v1017_v8  ;;  %581 = vmatpush1.bf16.msra.mxu1 %v1019_v9  ;;  %v1035_v20 = vld [vmem:[#allocation4 + $0x44] ss:$16 sps:$4 sm:$0xff]   ;;  %v1037_v21 = vld [vmem:[#allocation4 + $0x68] ss:$16 sps:$4 sm:$0xff]   ;;  %v1039_v22 = vld [vmem:[#allocation4 + $0x4c] ss:$16 sps:$4 sm:$0xff]  }
  0x26   : > { %582 = vmatprep.subr.bf16.mxu1 %v1021_v11  ;;  %v1038_v23 = vld [vmem:[#allocation4 + $0x40] ss:$16 sps:$4 sm:$0xff]   ;;  %v1041_v24 = vld [vmem:[#allocation4 + $0x24] ss:$16 sps:$4 sm:$0xff]   ;;  %v1043_v25 = vld [vmem:[#allocation4 + $0x48] ss:$16 sps:$4 sm:$0xff]  }
  0x27   : > { %v1215_v26 = vld [vmem:[%s326_s19] sm:$0xf]  ;;  %v1044_v30 = vld [vmem:[#allocation4 + $0x20] ss:$16 sps:$4 sm:$0xff]   ;;  %v1047_v31 = vld [vmem:[#allocation4 + $0x4] ss:$16 sps:$4 sm:$0xff]  }
  0x28   : > { %542 = vmatpush1.bf16.msra.mxu0 %v1020_v10  ;;  %v1045_v27 = vld [vmem:[#allocation4 + $0x2c] ss:$16 sps:$4 sm:$0xff]   ;;  %v680_v28 = vunpack.c.l.bf16 %v1215_v26  ;;  %v1049_v32 = vld [vmem:[#allocation4 + $0x28] ss:$16 sps:$4 sm:$0xff]   ;;  %v1050_v34 = vld [vmem:[#allocation4] ss:$16 sps:$4 sm:$0xff]  }
  0x29   : > { %543 = vmatprep.subr.bf16.mxu0 %v1023_v12  ;;  %583 = vmatpush1.bf16.msra.mxu1 %v1025_v13  ;;  %v631_v29 = vld [vmem:[%s1255_s5] sm:$0xf]  ;;  %v1053_v35 = vld [vmem:[#allocation4 + $0x8] ss:$16 sps:$4 sm:$0xff]   ;;  %v1120_v37 = vmov 0.0   ;;  %vm1121_vm0 = vmmov 0  }
  0x2a   : > { %584 = vmatprep.subr.bf16.mxu1 %v1027_v14  ;;  %634 = vperm.xlu0 %1005, %v631_v29   ;;  %v1051_v33 = vld [vmem:[#allocation4 + $0xc] ss:$16 sps:$4 sm:$0xff]   ;;  %vm677_vm1 = vcmask 60416   ;;  %s1228_s30 = smov 0  }
  0x2b   : > { %v344_v36 = vld [vmem:[%s319_s27] sm:$0xf] }
  0x2c   : > { %544 = vmatpush1.bf16.msra.mxu0 %v1026_v15  ;;  %v630_v38 = vld [vmem:[%s1254_s4] sm:$0x3] }
  0x2d   : > { %545 = vmatprep.subr.bf16.mxu0 %v1029_v16  ;;  %585 = vmatpush1.bf16.msra.mxu1 %v1031_v17 }
  0x2e   : > { %586 = vmatprep.subr.bf16.mxu1 %v1033_v18 }
  0x30   : > { %546 = vmatpush1.bf16.msra.mxu0 %v1032_v19 }
  0x31   : > { %547 = vmatprep.subr.bf16.mxu0 %v1035_v20  ;;  %587 = vmatpush1.bf16.msra.mxu1 %v1037_v21 }
  0x32   : > { %588 = vmatprep.subr.bf16.mxu1 %v1039_v22 }
  0x34   : > { %548 = vmatpush1.bf16.msra.mxu0 %v1038_v23 }
  0x35   : > { %549 = vmatprep.subr.bf16.mxu0 %v1041_v24  ;;  %589 = vmatpush1.bf16.msra.mxu1 %v1043_v25 }
  0x36   : > { %590 = vmatprep.subr.bf16.mxu1 %v1045_v27 }
  0x38   : > { %550 = vmatpush1.bf16.msra.mxu0 %v1044_v30 }
  0x39   : > { %551 = vmatprep.subr.bf16.mxu0 %v1047_v31  ;;  %591 = vmatpush1.bf16.msra.mxu1 %v1049_v32 }
  0x3a   : > { %592 = vmatprep.subr.bf16.mxu1 %v1051_v33 }
  0x3c   : > { %552 = vmatpush1.bf16.msra.mxu0 %v1050_v34 }
  0x3d   : > { %943 = vmatprep.subr.bf16.mxu0 %v1120_v37  ;;  %593 = vmatpush1.bf16.msra.mxu1 %v1053_v35 }
  0x3f   : > { %570 = vmatmul.mubr.bf16.vlgmr.msra.gmra.mxu0 %v344_v36 }
  0x40   : > { %944 = vmatpush3.bf16.xpose.msra.mxu0 %v344_v36  ;;  %945 = vmatprep.mubr.msk.bf16.mxu0 %vm1121_vm0, %v1120_v37 }
  0x41   : > { %611 = vmatmul.mubr.bf16.vlgmr.msra.gmra.mxu1 %v344_v36 }
  0x47   : > { %946 = vmatmul.mubr.bf16.vlgmr.msra.gmra.mxu0 %v630_v38 }
  0xa5   : > { %v635_v46 = vpop.permute.xlu0 %634 }
  0xff   : > { %v571_v39 = vpop.f32.mrf.mxu0 }
 0x101   : > { %v573_v40 = vpop.f32.mrf.mxu0  ;;  %v612_v41 = vpop.f32.mrf.mxu1 }
 0x102   : > { %v932_v42 = vpack.c.bf16 %v573_v40, %v571_v39 }
 0x103   : > { %v575_v43 = vpop.f32.mrf.mxu0  ;;  %v614_v44 = vpop.f32.mrf.mxu1 }
 0x104   : > { %933 = vst [vmem:[#allocation2] sm:$0xff] %v932_v42   ;;  %v937_v45 = vpack.c.bf16 %v614_v44, %v612_v41 }
 0x105   : > { %v576_v47 = vpop.f32.mrf.mxu0  ;;  %v616_v48 = vpop.f32.mrf.mxu1 }
 0x106   : > { %938 = vst [vmem:[#allocation2 + $0x8] sm:$0xff] %v937_v45  }
 0x107   : > { %v671_v49 = vpop.f32.mrf.mxu0  ;;  %v617_v50 = vpop.f32.mrf.mxu1 }
 0x108   : > { %v672_v51 = vadd.f32 %v671_v49, %v635_v46 }
 0x109   : > { %v947_v52 = vpop.f32.mrf.mxu0 }
 0x10a   : > { %678 = vst.msk [vmem:[#allocation3] sm:$0xf] %vm677_vm1, %v672_v51 }
 0x10b   : > { %v674_v53 = vpop.f32.mrf.mxu0 }
 0x10d   : > { %v948_v54 = vpop.f32.mrf.mxu0 }
 0x10e LB: >> { %v1122_v55 = vmov 0.0   ;;  %vm1123_vm2 = vmmov 0   ;;  %s923_s7 = sshll.u32 %s1114_s30, 2  ;;  %s690_s10 = scalar_lea.vmem %s1253_s3, %s1114_s30  ;;  %s1114_s30 = sphi %s1228_s30, %s686_s30  }
 0x10f   : >> { %949 = vmatprep.subr.bf16.mxu0 %v1122_v55  ;;  %951 = vmatprep.mubr.msk.bf16.mxu0 %vm1123_vm2, %v1122_v55  ;;  %v924_v56 = vld [vmem:[%s690_s10] ss:$0 sm:$0xff]  ;;  %s688_s11 = scalar_lea.vmem [#allocation2], %s923_s7  ;;  %s739_s12 = scalar_lea.vmem [#allocation3], %s1114_s30 }
 0x110   : >> { %v689_v57 = vld [vmem:[%s688_s11] sm:$0xf]  ;;  %v696_v58 = vmul.f32 %v924_v56, %v680_v28  ;;  %s748_s13 = scalar_lea.vmem %s1205_s15, %s923_s7  ;;  %s686_s30 = sadd.s32 1, %s1114_s30  }
 0x111   : >> { %950 = vmatpush3.bf16.xpose.msra.mxu0 %v689_v57  ;;  %v925_v61 = vld [vmem:[%s739_s12] ss:$0 sm:$0xff]  ;;  %p683_p3 = scmp.ge.s32.totalorder %s686_s30, 4  }
 0x112   : >> { %697 = vadd.xlane.f32.xlu0 %v696_v58 }
 0x118   : >> { %952 = vmatmul.mubr.bf16.vlgmr.msra.gmra.mxu0 %v1215_v26 }
 0x19b   : >> { %v698_v59 = vpop.xlane.xlu0 %697 }
 0x1d8   : >> { %v733_v60 = vpop.f32.mrf.mxu0 }
 0x1d9   : >> { %v734_v62 = vadd.f32 %v733_v60, %v698_v59 }
 0x1da   : >> { %v953_v63 = vpop.f32.mrf.mxu0 }
 0x1db   : >> { %v745_v0 = vadd.f32 %v925_v61, %v734_v62  ;;  %685 = sbr.rel (!%p683_p3) target bundleno = 270 (0x10e), region = 100 }
 0x1dc   : >> { %v736_v1 = vpop.f32.mrf.mxu0 }
 0x1dd   : >> { %v746_v2 = vpack.c.bf16 %v745_v0, %v745_v0 }
 0x1de   : >> { %v954_v3 = vpop.f32.mrf.mxu0 }
 0x1df   : >> { %750 = vst.msk [vmem:[%s748_s13] sm:$0xf] %vm677_vm1, %v746_v2 }
 0x1e0 PF: > { %s17_s23 = sadd.s32 1, %s1110_s23   ;;  %s1259_s21 = smov %s1106_s22 }
 0x1e1   : > { %p14_p4 = scmp.ge.s32.totalorder %s17_s23, 4   ;;  %s1260_s22 = smov %s1262_s25 }
 0x1e3   :  { %16 = sbr.rel (!%p14_p4) target bundleno = 2 (0x2), region = 111 }
 0x1e8   :  { %785 = vsyncpa [#allocation5], 1 }
 0x1e9   :  { %787 = vsyncpa [#allocation5 + $0x1], 1 }

</bundles_post_ra>
